<compile_context>
chip_gen: v7x
topology: tpu7x:2x2x1
jax: 0.10.0
libtpu: 0.0.40
codegen_flags: <defaults>
</compile_context>

<pallas_src>
import functools

import jax
import jax.numpy as jnp
from jax.experimental import pallas as pl
from jax.experimental.pallas import tpu as pltpu


def _repvgg_dw_kernel(x_ref, w_ref, b_ref, m_ref, o_ref, *, K, W_img):
    """One (batch, channel-block) tile per grid step.

    x_ref : (1, tC, L)   activations (input dtype); flattened (padded) spatial on lanes
    w_ref : (tC, K*K)    folded depthwise weights (f32), tap index t = dy*K + dx
    b_ref : (tC, 1)      folded per-channel bias (f32)
    m_ref : (2K, L)      rows [0,K): column masks per dx; rows [K,2K): row masks per dy
    o_ref : (1, tC, L)   output (same dtype as x)
    """
    P = (K - 1) // 2
    L = x_ref.shape[2]

    xf = x_ref[0, :, :].astype(jnp.float32)                      # (tC, L)

    # Row-shifted, row-masked slabs: slab_dy[w] == x[w + (dy-P)*W] inside the
    # image, 0 for rows outside it.  Shifts live on the XLU via pltpu.roll; the
    # roll wrap-around lanes are killed by the row/column masks.
    slabs = []
    for dy in range(K):
        oy = dy - P
        if oy == 0:
            slabs.append(xf)
        else:
            s = pltpu.roll(xf, shift=(-oy * W_img) % L, axis=1)
            slabs.append(s * m_ref[K + dy:K + dy + 1, :])

    # Group taps by kernel column dx: accumulate over dy first, then apply one
    # lane roll + one column mask per non-center column.
    out = None
    for dx in range(K):
        ox = dx - P
        col = None
        for dy in range(K):
            t = dy * K + dx
            term = slabs[dy] * w_ref[:, t:t + 1]                 # per-channel weight
            col = term if col is None else col + term
        if ox != 0:
            col = pltpu.roll(col, shift=(-ox) % L, axis=1) * m_ref[dx:dx + 1, :]
        out = col if out is None else out + col

    o_ref[0, :, :] = (out + b_ref[...]).astype(o_ref.dtype)


def _pick_block_channels(C, L, act_itemsize, n_batch, max_f32_bytes=2 * 1024 * 1024):
    """Largest channel tile that (a) divides C, (b) respects sublane packing for
    the activation dtype (8 for f32, 16 for bf16, 32 for 8-bit), (c) keeps the
    f32 working slice within ~2 MiB, and (d) prefers >=8 total grid steps so the
    BlockSpec pipeline has depth even when split across two TensorCores."""
    gran = {4: 8, 2: 16, 1: 32}.get(act_itemsize, 8)
    if C <= gran or C % gran != 0:
        return C
    candidates = [c for c in range(gran, C + 1, gran)
                  if C % c == 0 and c * L * 4 <= max_f32_bytes]
    if not candidates:
        return gran
    deep = [c for c in candidates if n_batch * (C // c) >= 8]
    return max(deep) if deep else max(candidates)


def repvgg_dw_forward(x_nchw, params, kernel_size):
    """Fused RepVggDw forward (eval semantics) as a Pallas TPU kernel.

    x_nchw: (N, C, H, W), float32 or bfloat16 (PyTorch layout).  Output has the
    same layout and dtype; accumulation is always f32.
    """
    eps = 1e-5
    K = kernel_size
    P = (K - 1) // 2
    f32 = jnp.float32

    # ---- fold BN1 / BN2 / 1x1-dw / identity into conv weights + bias (glue) ----
    g1, b1, m1, v1 = (params["bn1_w"].astype(f32), params["bn1_b"].astype(f32),
                      params["bn1_m"].astype(f32), params["bn1_v"].astype(f32))
    g2, b2, m2, v2 = (params["bn2_w"].astype(f32), params["bn2_b"].astype(f32),
                      params["bn2_m"].astype(f32), params["bn2_v"].astype(f32))
    w1 = params["conv1_w"].astype(f32)       # (C,)   depthwise 1x1 weight
    b1c = params["conv1_b"].astype(f32)      # (C,)   depthwise 1x1 bias
    wk = params["conv_w"].astype(f32)        # (C, K, K) depthwise kxk weight

    a1 = g1 / jnp.sqrt(v1 + eps)
    c1 = b1 - m1 * a1
    a2 = g2 / jnp.sqrt(v2 + eps)
    c2 = b2 - m2 * a2

    conv_scale = a2 * a1                     # (C,)
    x_scale = a2 * (w1 + 1.0)                # (C,)  identity + 1x1 branch
    bias = a2 * (c1 + b1c) + c2              # (C,)

    C = wk.shape[0]
    w_eff = wk * conv_scale[:, None, None]                    # (C, K, K)
    w_eff = w_eff.at[:, P, P].add(x_scale)                    # identity/1x1 -> center tap
    w_flat = w_eff.reshape(C, K * K)                          # (C, K*K), f32
    bias2 = bias.reshape(C, 1)                                # (C, 1),  f32

    # ---- layout: free reshape NCHW -> (N, C, H*W); lane-dense last dim --------
    N, C_, H, W = x_nchw.shape
    assert C_ == C, "channel mismatch between x and params"
    HW = H * W
    L = HW if HW % 128 == 0 else ((HW + 127) // 128) * 128
    x_flat = x_nchw.reshape(N, C, HW)
    if L != HW:
        x_flat = jnp.pad(x_flat, ((0, 0), (0, 0), (0, L - HW)))

    # Validity masks over the flattened (padded) spatial axis.
    #   column mask (per dx): output column w may read column w + (dx-P)
    #   row    mask (per dy): output row    h may read row    h + (dy-P)
    # Values past HW are don't-care (those outputs are sliced away).
    idx = jnp.arange(L, dtype=jnp.int32)
    wpos = idx % W
    hpos = idx // W
    masks = []
    for dx in range(K):
        ox = dx - P
        masks.append(((wpos + ox >= 0) & (wpos + ox <= W - 1)).astype(f32))
    for dy in range(K):
        oy = dy - P
        masks.append(((hpos + oy >= 0) & (hpos + oy <= H - 1)).astype(f32))
    mask_arr = jnp.stack(masks, axis=0)                        # (2K, L), f32

    tC = _pick_block_channels(C, L, jnp.dtype(x_nchw.dtype).itemsize, N)
    grid = (N, C // tC)

    kernel = functools.partial(_repvgg_dw_kernel, K=K, W_img=W)

    out_flat = pl.pallas_call(
        kernel,
        out_shape=jax.ShapeDtypeStruct((N, C, L), x_nchw.dtype),
        grid_spec=pltpu.PrefetchScalarGridSpec(
            num_scalar_prefetch=0,
            grid=grid,
            in_specs=[
                pl.BlockSpec((1, tC, L), lambda n, c: (n, c, 0)),     # x
                pl.BlockSpec((tC, K * K), lambda n, c: (c, 0)),       # folded weights
                pl.BlockSpec((tC, 1), lambda n, c: (c, 0)),           # folded bias
                pl.BlockSpec((2 * K, L), lambda n, c: (0, 0)),        # row/col masks
            ],
            out_specs=pl.BlockSpec((1, tC, L), lambda n, c: (n, c, 0)),
        ),
        compiler_params=pltpu.CompilerParams(
            dimension_semantics=("parallel", "parallel"),
            vmem_limit_bytes=32 * 1024 * 1024,
        ),
    )(x_flat, w_flat, bias2, mask_arr)

    if L != HW:
        out_flat = out_flat[:, :, :HW]
    return out_flat.reshape(N, C, H, W)


def init_params(key, ed, kernel_size):
    """Deterministic synthetic parameters matching RepVggDw(ed, k, legacy=False)."""
    ks = jax.random.split(key, 8)
    return {
        # ConvNorm depthwise kxk conv weight: torch shape (ed, 1, k, k) -> (ed, k, k)
        "conv_w": jax.random.normal(ks[0], (ed, kernel_size, kernel_size), jnp.float32) * 0.1,
        # BN inside ConvNorm (weight init 1, bias init 0 per ConvNorm.__init__)
        "bn1_w": jnp.ones((ed,), jnp.float32),
        "bn1_b": jnp.zeros((ed,), jnp.float32),
        "bn1_m": jax.random.normal(ks[1], (ed,), jnp.float32) * 0.05,
        "bn1_v": jnp.abs(jax.random.normal(ks[2], (ed,), jnp.float32)) * 0.1 + 0.9,
        # conv1: depthwise 1x1 conv with bias: torch weight (ed,1,1,1) -> (ed,)
        "conv1_w": jax.random.normal(ks[3], (ed,), jnp.float32) * 0.1,
        "conv1_b": jax.random.normal(ks[4], (ed,), jnp.float32) * 0.05,
        # self.bn (BatchNorm2d) running stats + affine
        "bn2_w": jnp.ones((ed,), jnp.float32) + jax.random.normal(ks[5], (ed,), jnp.float32) * 0.05,
        "bn2_b": jax.random.normal(ks[6], (ed,), jnp.float32) * 0.05,
        "bn2_m": jax.random.normal(ks[7], (ed,), jnp.float32) * 0.05,
        "bn2_v": jnp.ones((ed,), jnp.float32),
    }


def _reference_forward(x_nchw, params, kernel_size):
    """Unfused pure-JAX reference (mirrors the PyTorch eval-mode forward)."""
    eps = 1e-5
    K = kernel_size
    P = (K - 1) // 2
    x = x_nchw.astype(jnp.float32)
    N, C, H, W = x.shape
    xpad = jnp.pad(x, ((0, 0), (0, 0), (P, P), (P, P)))
    conv = jnp.zeros_like(x)
    for dy in range(K):
        for dx in range(K):
            conv = conv + xpad[:, :, dy:dy + H, dx:dx + W] * \
                params["conv_w"][None, :, dy, dx, None, None]
    a1 = params["bn1_w"] / jnp.sqrt(params["bn1_v"] + eps)
    y1 = (conv - params["bn1_m"][None, :, None, None]) * a1[None, :, None, None] \
        + params["bn1_b"][None, :, None, None]
    y2 = x * params["conv1_w"][None, :, None, None] + params["conv1_b"][None, :, None, None]
    s = y1 + y2 + x
    a2 = params["bn2_w"] / jnp.sqrt(params["bn2_v"] + eps)
    return (s - params["bn2_m"][None, :, None, None]) * a2[None, :, None, None] \
        + params["bn2_b"][None, :, None, None]


if __name__ == "__main__":
    key = jax.random.PRNGKey(0)
    k_x, k_p, k_x2, k_p2, k_x3, k_p3 = jax.random.split(key, 6)
    KSIZE = 3

    # --- config 1: small shapes matching the module spec (NCHW, HW aligned) ----
    N, ED, H, W = 2, 4, 16, 16
    x = jax.random.normal(k_x, (N, ED, H, W), jnp.float32)
    params = init_params(k_p, ED, KSIZE)
    ref = _reference_forward(x, params, KSIZE)

    out = jax.block_until_ready(repvgg_dw_forward(x, params, KSIZE))
    assert out.shape == (N, ED, H, W) and out.dtype == jnp.float32
    assert jnp.allclose(out, ref, atol=1e-4, rtol=1e-4), "f32 mismatch vs reference"

    # bf16 activations through the same kernel (f32 accumulation inside).
    out_bf16 = jax.block_until_ready(
        repvgg_dw_forward(x.astype(jnp.bfloat16), params, KSIZE))
    assert out_bf16.dtype == jnp.bfloat16
    assert jnp.allclose(out_bf16.astype(jnp.float32), ref, atol=5e-2, rtol=5e-2), \
        "bf16 mismatch vs reference"

    # --- config 2: non-square spatial, lane-padding path (HW=480 -> L=512) -----
    N2, ED2, H2, W2 = 1, 16, 24, 20
    x2 = jax.random.normal(k_x2, (N2, ED2, H2, W2), jnp.float32)
    params2 = init_params(k_p2, ED2, KSIZE)
    ref2 = _reference_forward(x2, params2, KSIZE)
    out2 = jax.block_until_ready(repvgg_dw_forward(x2, params2, KSIZE))
    assert jnp.allclose(out2, ref2, atol=1e-4, rtol=1e-4), "config2 mismatch vs reference"

    # --- config 3: more channels -> exercises the channel-tiled grid path ------
    N3, ED3, H3, W3 = 2, 32, 16, 16
    x3 = jax.random.normal(k_x3, (N3, ED3, H3, W3), jnp.float32)
    params3 = init_params(k_p3, ED3, KSIZE)
    ref3 = _reference_forward(x3, params3, KSIZE)
    out3 = jax.block_until_ready(repvgg_dw_forward(x3, params3, KSIZE))
    assert jnp.allclose(out3, ref3, atol=1e-4, rtol=1e-4), "config3 mismatch vs reference"

    print("KERNEL_OK")
</pallas_src>

<mosaic_0001>
module attributes {stable_mosaic.version = 11 : i64} {
  func.func @_repvgg_dw_kernel(%arg0: i32, %arg1: i32, %arg2: memref<1x4x256xf32, #tpu.memory_space<vmem>>, %arg3: memref<4x9xf32, #tpu.memory_space<vmem>>, %arg4: memref<4x1xf32, #tpu.memory_space<vmem>>, %arg5: memref<6x256xf32, #tpu.memory_space<vmem>>, %arg6: memref<1x4x256xf32, #tpu.memory_space<vmem>>) attributes {dimension_semantics = [#tpu.dimension_semantics<parallel>, #tpu.dimension_semantics<parallel>], iteration_bounds = array<i64: 2, 1>, scalar_prefetch = 0 : i64, scratch_operands = 0 : i64, tpu.core_type = #tpu.core_type<tc>, window_params = [{transform_indices = @transform_0, window_bounds = array<i64: 1, 4, 256>}, {transform_indices = @transform_1, window_bounds = array<i64: 4, 9>}, {transform_indices = @transform_2, window_bounds = array<i64: 4, 1>}, {pipeline_mode = #tpu.pipeline_mode<synchronous>, transform_indices = @transform_3, window_bounds = array<i64: 6, 256>}, {transform_indices = @transform_4, window_bounds = array<i64: 1, 4, 256>}]} {
    %c0 = arith.constant 0 : index
    %c0_0 = arith.constant 0 : index
    %c0_1 = arith.constant 0 : index
    %0 = vector.load %arg2[%c0, %c0_0, %c0_1] : memref<1x4x256xf32, #tpu.memory_space<vmem>>, vector<1x4x256xf32>
    %1 = vector.shape_cast %0 : vector<1x4x256xf32> to vector<4x256xf32>
    %c16_i32 = arith.constant 16 : i32
    %2 = tpu.dynamic_rotate %1 by %c16_i32 dim 1 : vector<4x256xf32>, i32 -> vector<4x256xf32>
    %c3 = arith.constant 3 : index
    %c0_2 = arith.constant 0 : index
    %3 = vector.load %arg5[%c3, %c0_2] : memref<6x256xf32, #tpu.memory_space<vmem>>, vector<1x256xf32>
    %4 = vector.broadcast %3 : vector<1x256xf32> to vector<4x256xf32>
    %5 = arith.mulf %2, %4 : vector<4x256xf32>
    %c240_i32 = arith.constant 240 : i32
    %6 = tpu.dynamic_rotate %1 by %c240_i32 dim 1 : vector<4x256xf32>, i32 -> vector<4x256xf32>
    %c5 = arith.constant 5 : index
    %c0_3 = arith.constant 0 : index
    %7 = vector.load %arg5[%c5, %c0_3] : memref<6x256xf32, #tpu.memory_space<vmem>>, vector<1x256xf32>
    %8 = vector.broadcast %7 : vector<1x256xf32> to vector<4x256xf32>
    %9 = arith.mulf %6, %8 : vector<4x256xf32>
    %c0_4 = arith.constant 0 : index
    %c0_5 = arith.constant 0 : index
    %10 = vector.load %arg3[%c0_4, %c0_5] : memref<4x9xf32, #tpu.memory_space<vmem>>, vector<4x1xf32>
    %11 = vector.broadcast %10 : vector<4x1xf32> to vector<4x256xf32>
    %12 = arith.mulf %5, %11 : vector<4x256xf32>
    %c0_6 = arith.constant 0 : index
    %c3_7 = arith.constant 3 : index
    %13 = vector.load %arg3[%c0_6, %c3_7] : memref<4x9xf32, #tpu.memory_space<vmem>>, vector<4x1xf32>
    %14 = vector.broadcast %13 : vector<4x1xf32> to vector<4x256xf32>
    %15 = arith.mulf %1, %14 : vector<4x256xf32>
    %16 = arith.addf %12, %15 : vector<4x256xf32>
    %c0_8 = arith.constant 0 : index
    %c6 = arith.constant 6 : index
    %17 = vector.load %arg3[%c0_8, %c6] : memref<4x9xf32, #tpu.memory_space<vmem>>, vector<4x1xf32>
    %18 = vector.broadcast %17 : vector<4x1xf32> to vector<4x256xf32>
    %19 = arith.mulf %9, %18 : vector<4x256xf32>
    %20 = arith.addf %16, %19 : vector<4x256xf32>
    %c1_i32 = arith.constant 1 : i32
    %21 = tpu.dynamic_rotate %20 by %c1_i32 dim 1 : vector<4x256xf32>, i32 -> vector<4x256xf32>
    %c0_9 = arith.constant 0 : index
    %c0_10 = arith.constant 0 : index
    %22 = vector.load %arg5[%c0_9, %c0_10] : memref<6x256xf32, #tpu.memory_space<vmem>>, vector<1x256xf32>
    %23 = vector.broadcast %22 : vector<1x256xf32> to vector<4x256xf32>
    %24 = arith.mulf %21, %23 : vector<4x256xf32>
    %c0_11 = arith.constant 0 : index
    %c1 = arith.constant 1 : index
    %25 = vector.load %arg3[%c0_11, %c1] : memref<4x9xf32, #tpu.memory_space<vmem>>, vector<4x1xf32>
    %26 = vector.broadcast %25 : vector<4x1xf32> to vector<4x256xf32>
    %27 = arith.mulf %5, %26 : vector<4x256xf32>
    %c0_12 = arith.constant 0 : index
    %c4 = arith.constant 4 : index
    %28 = vector.load %arg3[%c0_12, %c4] : memref<4x9xf32, #tpu.memory_space<vmem>>, vector<4x1xf32>
    %29 = vector.broadcast %28 : vector<4x1xf32> to vector<4x256xf32>
    %30 = arith.mulf %1, %29 : vector<4x256xf32>
    %31 = arith.addf %27, %30 : vector<4x256xf32>
    %c0_13 = arith.constant 0 : index
    %c7 = arith.constant 7 : index
    %32 = vector.load %arg3[%c0_13, %c7] : memref<4x9xf32, #tpu.memory_space<vmem>>, vector<4x1xf32>
    %33 = vector.broadcast %32 : vector<4x1xf32> to vector<4x256xf32>
    %34 = arith.mulf %9, %33 : vector<4x256xf32>
    %35 = arith.addf %31, %34 : vector<4x256xf32>
    %36 = arith.addf %24, %35 : vector<4x256xf32>
    %c0_14 = arith.constant 0 : index
    %c2 = arith.constant 2 : index
    %37 = vector.load %arg3[%c0_14, %c2] : memref<4x9xf32, #tpu.memory_space<vmem>>, vector<4x1xf32>
    %38 = vector.broadcast %37 : vector<4x1xf32> to vector<4x256xf32>
    %39 = arith.mulf %5, %38 : vector<4x256xf32>
    %c0_15 = arith.constant 0 : index
    %c5_16 = arith.constant 5 : index
    %40 = vector.load %arg3[%c0_15, %c5_16] : memref<4x9xf32, #tpu.memory_space<vmem>>, vector<4x1xf32>
    %41 = vector.broadcast %40 : vector<4x1xf32> to vector<4x256xf32>
    %42 = arith.mulf %1, %41 : vector<4x256xf32>
    %43 = arith.addf %39, %42 : vector<4x256xf32>
    %c0_17 = arith.constant 0 : index
    %c8 = arith.constant 8 : index
    %44 = vector.load %arg3[%c0_17, %c8] : memref<4x9xf32, #tpu.memory_space<vmem>>, vector<4x1xf32>
    %45 = vector.broadcast %44 : vector<4x1xf32> to vector<4x256xf32>
    %46 = arith.mulf %9, %45 : vector<4x256xf32>
    %47 = arith.addf %43, %46 : vector<4x256xf32>
    %c255_i32 = arith.constant 255 : i32
    %48 = tpu.dynamic_rotate %47 by %c255_i32 dim 1 : vector<4x256xf32>, i32 -> vector<4x256xf32>
    %c2_18 = arith.constant 2 : index
    %c0_19 = arith.constant 0 : index
    %49 = vector.load %arg5[%c2_18, %c0_19] : memref<6x256xf32, #tpu.memory_space<vmem>>, vector<1x256xf32>
    %50 = vector.broadcast %49 : vector<1x256xf32> to vector<4x256xf32>
    %51 = arith.mulf %48, %50 : vector<4x256xf32>
    %52 = arith.addf %36, %51 : vector<4x256xf32>
    %c0_20 = arith.constant 0 : index
    %c0_21 = arith.constant 0 : index
    %53 = vector.load %arg4[%c0_20, %c0_21] : memref<4x1xf32, #tpu.memory_space<vmem>>, vector<4x1xf32>
    %54 = vector.broadcast %53 : vector<4x1xf32> to vector<4x256xf32>
    %55 = arith.addf %52, %54 : vector<4x256xf32>
    %c0_22 = arith.constant 0 : index
    %c0_23 = arith.constant 0 : index
    %c0_24 = arith.constant 0 : index
    %56 = vector.load %arg6[%c0_22, %c0_23, %c0_24] : memref<1x4x256xf32, #tpu.memory_space<vmem>>, vector<1x4x256xf32>
    %57 = vector.shape_cast %56 : vector<1x4x256xf32> to vector<4x256xf32>
    %58 = vector.shape_cast %55 : vector<4x256xf32> to vector<1x4x256xf32>
    tpu.vector_store %arg6[%c0_22, %c0_23, %c0_24], %58 {strides = array<i32>} : memref<1x4x256xf32, #tpu.memory_space<vmem>>, vector<1x4x256xf32>,
    return
  }
  func.func @transform_0(%arg0: i32, %arg1: i32) -> (i32, i32, i32) {
    %c0_i32 = arith.constant 0 : i32
    %c0_i32_0 = arith.constant 0 : i32
    return %arg0, %arg1, %c0_i32 : i32, i32, i32
  }
  func.func @transform_1(%arg0: i32, %arg1: i32) -> (i32, i32) {
    %c0_i32 = arith.constant 0 : i32
    %c0_i32_0 = arith.constant 0 : i32
    return %arg1, %c0_i32 : i32, i32
  }
  func.func @transform_2(%arg0: i32, %arg1: i32) -> (i32, i32) {
    %c0_i32 = arith.constant 0 : i32
    %c0_i32_0 = arith.constant 0 : i32
    return %arg1, %c0_i32 : i32, i32
  }
  func.func @transform_3(%arg0: i32, %arg1: i32) -> (i32, i32) {
    %c0_i32 = arith.constant 0 : i32
    %c0_i32_0 = arith.constant 0 : i32
    %c0_i32_1 = arith.constant 0 : i32
    return %c0_i32, %c0_i32_0 : i32, i32
  }
  func.func @transform_4(%arg0: i32, %arg1: i32) -> (i32, i32, i32) {
    %c0_i32 = arith.constant 0 : i32
    %c0_i32_0 = arith.constant 0 : i32
    return %arg0, %arg1, %c0_i32 : i32, i32, i32
  }
}

</mosaic_0001>

<bundles_post_ra>
// kernel: tpu_custom_call.1
= control target key start
LH: loop header
LB: loop body
LE: loop exit
PB: predicated region body
PF: predicated region fallthrough
CT: control target
= control target key end

     0   :  { %9 = vsyncpa [#allocation3], 0  ;;  %s1179_s0 = inlined_call_operand.hbm [shape: f32[2,4,256], index: 0, kind: input, shape index: {}]   ;;  %s1180_s1 = inlined_call_operand.hbm [shape: f32[4,9], index: 1, kind: input, shape index: {}]   ;;  %s1181_s2 = inlined_call_operand.vmem [shape: f32[4,1], index: 2, kind: input, shape index: {}]   ;;  %s1182_s3 = inlined_call_operand.vmem [shape: f32[6,256], index: 3, kind: input, shape index: {}]   ;;  %s1183_s4 = inlined_call_operand.hbm [shape: f32[2,4,256], index: 4, kind: output, shape index: {}]  }
   0x1   :  { %11 = vsyncpa [#allocation3 + $0x1], 0 }
   0x2   :  { %12 = vsyncpa [#allocation6], 0 }
   0x3   :  { %13 = vsyncpa [#allocation4], 0 }
   0x4   :  { %15 = vsyncpa [#allocation4 + $0x1], 0  ;;  %s917_s15 = smov 0   ;;  %s919_s16 = smov 0  }
   0x5   :  { %s921_s17 = smov 0   ;;  %s923_s18 = smov 0  }
   0x6   :  { %s925_s19 = smov 0   ;;  %s927_s20 = smov 0  }
   0x7 LB: > { %s608_s21 = sadd.s32 4294967295, %s873_s20   ;;  %s609_s22 = sadd.s32 4294967294, %s873_s20   ;;  %s873_s20 = sphi %s927_s20, %s21_s20   ;;  %s869_s19 = sphi %s925_s19, %s1208_s19   ;;  %s865_s18 = sphi %s923_s18, %s1207_s18   ;;  %s861_s17 = sphi %s921_s17, %s1206_s17   ;;  %s857_s16 = sphi %s919_s16, %s1205_s16   ;;  %s853_s15 = sphi %s917_s15, %s1204_s15  }
   0x8   : > { %p55_p0 = scmp.ne.s32.totalorder %s857_s16, %s853_s15  ;;  %p951_p1 = scmp.eq.s32.totalorder %s608_s21, 0 }
   0x9   : > { %p955_p2 = scmp.eq.s32.totalorder %s608_s21, 1  ;;  %p160_p3 = scmp.eq.s32.totalorder %s609_s22, 1 }
   0xa   : > { %s1188_s23 = scalar_select %p951_p1, 1, 0 }
   0xb   : > { %s1189_s24 = scalar_select %p955_p2, 1, 0 }
   0xc   : > { %p961_p4 = por %p951_p1, %p55_p0  ;;  %p610_p5 = scmp.ge.s32.totalorder %s873_s20, 1 }
   0xd   : > { %p966_p6 = por %p160_p3, %p55_p0  ;;  %p167_p7 = scmp.lt.s32.totalorder %s873_s20, 3 }
   0xe   : > { %s1190_s25 = scalar_select %p961_p4, 1, 0 }
   0xf   : > { %s1191_s26 = scalar_select %p966_p6, 1, 0 }
  0x10   : > { %p971_p8 = pnand %p610_p5, %p167_p7  ;;  %s875_s28 = smov [#allocation5]  }
  0x11   : > { %s182_s29 = sshll.u32 %s875_s28, 4  ;;  %s33_s5 = sadd.s32 1, %s869_s19  ;;  %s183_s29 = int_to_ptr.vmem [resolvable:$true] %s182_s29 }
  0x12   : > { %s1192_s27 = scalar_select %p971_p8, 1, 0 }
  0x13   : > { %p639_p10 = pneg %p971_p8  ;;  %s42_s6 = sadd.s32 1, %s861_s17 }
  0x14   : > { %p986_p12 = scmp.ge.s32.totalorder %s33_s5, 2  ;;  %s729_s10 = scalar_lea.hbm %s1180_s1, 64 }
  0x15   : > { %p980_p11 = pnand %p639_p10, %p951_p1  ;;  %p730_p13 = scmp.ne.s32.totalorder %s1180_s1, %s729_s10 }
  0x16   : > { %s1194_s7 = scalar_select %p986_p12, 1, 0 }
  0x17   : > { %p731_p0 = pneg %p980_p11  ;;  %p736_p7 = scmp.lt.u32.totalorder %s729_s10, %s1180_s1 }
  0x19   : > { %p732_p3 = pnand %p731_p0, %p730_p13 }
  0x1b   : > { %p733_p5 = pneg %p732_p3 }
  0x1d   : > { %p738_p10 = pnand %p736_p7, %p733_p5 }
  0x1f   : > { %741 = shalt.err (!%p738_p10)
}
  0x20   : > { %s742_s21 = scalar_lea.vmem %s183_s29, 64  ;;  %p750_p4 = scmp.lt.s32.totalorder %s183_s29, %s183_s29 }
  0x21   : > { %p743_p9 = scmp.ne.s32.totalorder %s183_s29, %s742_s21  ;;  %p751_p8 = scmp.lt.s32.totalorder %s742_s21, %s742_s21 }
  0x23   : > { %p745_p6 = pnand %p743_p9, %p731_p0  ;;  %p752_p2 = por %p751_p8, %p750_p4 }
  0x25   : > { %p746_p1 = pneg %p745_p6 }
  0x27   : > { %p753_p12 = pnand %p752_p2, %p746_p1 }
  0x29   : > { %756 = shalt.err (!%p753_p12)
}
  0x2a   : > { %642 = dma.hbm_to_vmem [thread:$0]  (!%p980_p11), %s1180_s1, 64, %s183_s29, [#allocation6]  }
  0x2b   : > { %p1195_p4 = scmp.ne.s32.totalorder %s1194_s7, 0  ;;  %p49_p1 = scmp.ne.s32.totalorder %s861_s17, %s857_s16 }
  0x2c   : > { %p50_p2 = scmp.eq.s32.totalorder %s873_s20, 0  ;;  %p652_p6 = scmp.lt.s32.totalorder %s873_s20, 2 }
  0x2d   : > { %s1210_s5 = smov (%p1195_p4, %s33_s5), 0  ;;  %p1196_p12 = scmp.ne.s32.totalorder %s1189_s24, 0 }
  0x2e   : > { %s37_s30 = ssub.s32 %s869_s19, %s1210_s5  ;;  %p51_p9 = por %p50_p2, %p49_p1 }
  0x2f   : > { %p40_p8 = scmp.eq.s32.totalorder %s37_s30, 0  ;;  %p1018_p13 = por %p1196_p12, %p49_p1 }
  0x30   : > { %s203_s9 = sand.u32 1, %s861_s17   ;;  %s629_s7 = sshll.u32 %s869_s19, 7 }
  0x31   : > { %s1026_s10 = scalar_select %p40_p8, %s861_s17, %s42_s6  }
  0x32   : > { %s614_s29 = sshll.u32 %s203_s9, 3  ;;  %s1032_s13 = scalar_lea.hbm %s1179_s0, %s629_s7 }
  0x33   : > { %s207_s24 = scalar_lea.vmem [#allocation2], %s614_s29  ;;  %p1036_p11 = pnand %p652_p6, %p51_p9 }
  0x34   : > { %s217_s14 = sshll.u32 %s207_s24, 4  ;;  %s204_s6 = scalar_lea.sflag [#allocation3], %s203_s9  ;;  %s1034_s14 = int_to_ptr.vmem [resolvable:$true] %s217_s14 }
  0x35   : > { %s757_s22 = scalar_lea.hbm %s1032_s13, 128  ;;  %p759_p3 = pneg %p1036_p11 }
  0x36   : > { %p758_p0 = scmp.ne.s32.totalorder %s1032_s13, %s757_s22  ;;  %s762_s29 = scalar_lea.hbm %s1179_s0, 256 }
  0x37   : > { %p763_p10 = scmp.lt.u32.totalorder %s1032_s13, %s1179_s0  ;;  %p764_p4 = scmp.lt.u32.totalorder %s762_s29, %s757_s22 }
  0x38   : > { %p760_p5 = pnand %p759_p3, %p758_p0  ;;  %p766_p2 = scmp.lt.u32.totalorder %s757_s22, %s1032_s13 }
  0x39   : > { %p765_p1 = por %p764_p4, %p763_p10 }
  0x3a   : > { %p761_p7 = pneg %p760_p5 }
  0x3b   : > { %p767_p6 = por %p766_p2, %p765_p1 }
  0x3d   : > { %p768_p8 = pnand %p767_p6, %p761_p7 }
  0x3f   : > { %771 = shalt.err (!%p768_p8)
}
  0x40   : > { %s772_s9 = scalar_lea.vmem %s1034_s14, 128  ;;  %s876_s12 = smov [#allocation2]  }
  0x41   : > { %p773_p9 = scmp.ne.s32.totalorder %s1034_s14, %s772_s9  ;;  %s777_s24 = sshll.u32 %s876_s12, 4  ;;  %s778_s24 = int_to_ptr.vmem [resolvable:$false] %s777_s24 }
  0x42   : > { %s779_s28 = scalar_lea.vmem %s778_s24, 256  ;;  %p780_p5 = scmp.lt.s32.totalorder %s1034_s14, %s778_s24 }
  0x43   : > { %p775_p12 = pnand %p773_p9, %p759_p3  ;;  %p781_p10 = scmp.lt.s32.totalorder %s779_s28, %s772_s9 }
  0x45   : > { %p776_p0 = pneg %p775_p12  ;;  %p782_p4 = por %p781_p10, %p780_p5 }
  0x47   : > { %p783_p1 = pnand %p782_p4, %p776_p0 }
  0x49   : > { %786 = shalt.err (!%p783_p1)
}
  0x4a   : > { %646 = dma.hbm_to_vmem [thread:$0]  (!%p1036_p11), %s1032_s13, 128, %s1034_s14, %s204_s6  }
  0x4b   : > { %p1199_p7 = scmp.ne.s32.totalorder %s1192_s27, 0 }
  0x4c   : > { %s1068_s22 = sand.u32 (!%p1199_p7), 1, %s857_s16   ;;  %p1200_p3 = scmp.ne.s32.totalorder (!%p1199_p7), %s1190_s25, 0 }
  0x4d   : > { %226 = sbr.rel (%p1199_p7) target bundleno = 397 (0x18d), region = 36  ;;  %s618_s30 = sshll.u32 (!%p1199_p7), %s1068_s22, 3 }
  0x4e   : > { %s229_s29 = scalar_lea.sflag (!%p1199_p7), [#allocation3], %s1068_s22  ;;  %s232_s7 = scalar_lea.vmem (!%p1199_p7), [#allocation2], %s618_s30 }
  0x54   : > { %840 = dma.done.wait (%p1200_p3), %s229_s29, 128  }
  0x55   : > { %842 = vsyncadd (%p1200_p3), %s229_s29, 4294967168  ;;  %p1201_p11 = scmp.ne.s32.totalorder %s1188_s23, 0 }
  0x57   : > { %844 = dma.done.wait (%p1201_p11), [#allocation6], 64  }
  0x58   : > { %846 = vsyncadd (%p1201_p11), [#allocation6], 4294967232  ;;  %v877_v0 = vmov 0   ;;  %v878_v1 = vmov 3   ;;  %v319_v2 = vld [vmem:[#allocation5] sm:$0xf]  ;;  %v277_v17 = vlaneseq }
  0x59   : > { %720 = vset.pattern.permute.xlu1 %v877_v0  ;;  %718 = vset.pattern.permute.xlu0 %v878_v1  ;;  %v344_v3 = vld [vmem:[#allocation5] sm:$0xf]  ;;  %v879_v5 = vmov 6   ;;  %v880_v6 = vmov 5   ;;  %v1082_v7 = vld [vmem:[%s232_s7] sm:$0xff]  ;;  %v881_v8 = vmov 2  }
  0x5a   : > { %322 = vperm.xlu1 %720, %v319_v2   ;;  %328 = vperm.xlu0 %718, %v319_v2   ;;  %v398_v4 = vld [vmem:[#allocation5] sm:$0xf]  ;;  %s882_s23 = smov 16   ;;  %v271_v9 = vcombine.high %v1082_v7, %v1082_v7  ;;  %v883_v10 = vmov 8   ;;  %v884_v12 = vmov 1   ;;  %v885_v13 = vmov 4  }
  0x5b   : > { %v433_v11 = vld [vmem:[#allocation5] sm:$0xf]  ;;  %s886_s25 = smov 112   ;;  %v887_v14 = vmov 7   ;;  %v286_v20 = vshrl.u32 %v277_v17, 7  ;;  %v1088_v23 = vand.u32 127, %v277_v17 }
  0x5c   : > { %v888_v21 = vmov 839922192   ;;  %v621_v27 = vld [vmem:[%s1182_s3 + $0x3] ss:$8 sm:$0x3]  ;;  %s889_s6 = smov 127  }
  0x5d   : > { %v331_v22 = vunpack.c.l.s4 %v888_v21  ;;  %v1090_v26 = vsub.s32 0, %v286_v20  ;;  %vm279_vm0 = vcmp.lt.s32.totalorder %v1088_v23, 16  ;;  %v1096_v29 = vsub.s32 1, %v286_v20  ;;  %v622_v36 = vld [vmem:[%s1182_s3 + $0x5] ss:$8 sm:$0x3] }
  0x5e   : > { %721 = vset.pattern.permute.xlu1 %v879_v5  ;;  %719 = vset.pattern.permute.xlu0 %v880_v6  ;;  %vm301_vm1 = vcmp.lt.s32.totalorder %v1088_v23, 112  ;;  %s890_s11 = smov 1   ;;  %vm358_vm2 = vcmp.lt.s32.totalorder %v1088_v23, 1  ;;  %vm447_vm3 = vcmp.lt.s32.totalorder %v1088_v23, 127 }
  0x5f   : > { %347 = vperm.xlu1 %721, %v344_v3   ;;  %417 = vperm.xlu0 %719, %v398_v4   ;;  %v332_v28 = vunpack.c.0.s8 %v331_v22  ;;  %v288_v31 = vrot.slane %v621_v27, %v1090_v26  ;;  %v292_v35 = vrot.slane %v621_v27, %v1096_v29  ;;  %v310_v44 = vrot.slane %v622_v36, %v1090_v26  ;;  %v361_v22 = vld [vmem:[%s1182_s3] ss:$8 sm:$0x3] }
  0x60   : > { %v314_v45 = vrot.slane %v622_v36, %v1096_v29 }
  0x61   : > { %v335_v34 = vsub.s32 %v332_v28, %v286_v20  ;;  %v366_v28 = vrot.slane %v361_v22, %v1090_v26 }
  0x63   : > { %722 = vset.pattern.permute.xlu1 %v881_v8  ;;  %273 = vrot.lane.b32.xlu0 %v1082_v7, %s882_s23 }
  0x64   : > { %411 = vperm.xlu1 %722, %v398_v4   ;;  %723 = vset.pattern.permute.xlu0 %v883_v10 }
  0x67   : > { %436 = vperm.xlu0 %723, %v433_v11  }
  0x68   : > { %275 = vrot.lane.b32.xlu1 %v271_v9, %s882_s23  ;;  %s630_s23 = sshll.u32 %s865_s18, 7  ;;  %s891_s18 = smov [#allocation7]  }
  0x69   : > { %725 = vset.pattern.permute.xlu1 %v884_v12  ;;  %v467_v12 = vld [vmem:[%s1181_s2] sm:$0xf]  ;;  %s1130_s21 = scalar_lea.hbm %s1183_s4, %s630_s23 }
  0x6b   : > { %724 = vset.pattern.permute.xlu0 %v885_v13 }
  0x6c   : > { %297 = vrot.lane.b32.xlu1 %v1082_v7, %s886_s25  ;;  %382 = vperm.xlu0 %724, %v344_v3  }
  0x70   : > { %299 = vrot.lane.b32.xlu1 %v271_v9, %s886_s25  ;;  %727 = vset.pattern.permute.xlu0 %v877_v0  ;;  %s264_s25 = scalar_lea.vmem [#allocation7], %s618_s30  ;;  %s791_s30 = sshll.u32 %s891_s18, 4  ;;  %s792_s30 = int_to_ptr.vmem [resolvable:$false] %s791_s30 }
  0x71   : > { %s497_s27 = sshll.u32 %s264_s25, 4  ;;  %s793_s9 = scalar_lea.vmem %s792_s30, 256  ;;  %s1132_s27 = int_to_ptr.vmem [resolvable:$true] %s497_s27 }
  0x72   : > { %p794_p9 = scmp.lt.s32.totalorder %s1132_s27, %s792_s30 }
  0x74   : > { %376 = vperm.xlu1 %725, %v344_v3  }
  0x78   : > { %726 = vset.pattern.permute.xlu1 %v887_v14 }
  0x79   : > { %401 = vperm.xlu1 %726, %v398_v4  }
  0xd9   : > { %v323_v15 = vpop.permute.xlu1 %322  ;;  %v329_v16 = vpop.permute.xlu0 %328 }
  0xda   : > { %v336_v42 = vrot.slane %v329_v16, %v335_v34 }
  0xdc   : > { %v338_v53 = vmul.f32 %v336_v42, %v1082_v7 }
  0xde   : > { %v348_v18 = vpop.permute.xlu1 %347  ;;  %v418_v19 = vpop.permute.xlu0 %417  ;;  %v340_v2 = vcombine.high %v338_v53, %v338_v53 }
  0xdf   : > { %v425_v43 = vrot.slane %v418_v19, %v335_v34 }
  0xe1   : > { %v427_v54 = vmul.f32 %v425_v43, %v1082_v7 }
  0xe2   : > { %v274_v24 = vpop.permute.xlu0 %273 }
  0xe3   : > { %v412_v25 = vpop.permute.xlu1 %411  ;;  %v429_v9 = vcombine.high %v427_v54, %v427_v54 }
  0xe6   : > { %v437_v30 = vpop.permute.xlu0 %436 }
  0xe7   : > { %v276_v32 = vpop.permute.xlu1 %275 }
  0xe8   : > { %v281_v33 = vsel %vm279_vm0, %v276_v32, %v274_v24  ;;  %v280_v37 = vsel %vm279_vm0, %v274_v24, %v276_v32 }
  0xe9   : > { %v295_v38 = vmul.f32 %v288_v31, %v281_v33  ;;  %v296_v46 = vmul.f32 %v292_v35, %v280_v37 }
  0xeb   : > { %v298_v39 = vpop.permute.xlu1 %297  ;;  %v383_v40 = vpop.permute.xlu0 %382  ;;  %v325_v48 = vmul.f32 %v323_v15, %v295_v38  ;;  %v414_v49 = vmul.f32 %v412_v25, %v295_v38  ;;  %v326_v57 = vmul.f32 %v323_v15, %v296_v46  ;;  %v415_v10 = vmul.f32 %v412_v25, %v296_v46  ;;  %v623_v25 = vld [vmem:[%s1182_s3 + $0x2] ss:$8 sm:$0x3] }
  0xec   : > { %v390_v41 = vrot.slane %v383_v40, %v335_v34  ;;  %v456_v33 = vrot.slane %v623_v25, %v1090_v26  ;;  %v460_v34 = vrot.slane %v623_v25, %v1096_v29 }
  0xed   : > { %v431_v60 = vadd.f32 %v427_v54, %v414_v49  ;;  %v342_v62 = vadd.f32 %v338_v53, %v325_v48  ;;  %v432_v19 = vadd.f32 %v429_v9, %v415_v10 }
  0xee   : > { %v392_v47 = vmul.f32 %v390_v41, %v1082_v7  ;;  %v343_v7 = vadd.f32 %v340_v2, %v326_v57 }
  0xef   : > { %v300_v50 = vpop.permute.xlu1 %299 }
  0xf0   : > { %v302_v51 = vsel %vm301_vm1, %v298_v39, %v300_v50  ;;  %v303_v52 = vsel %vm301_vm1, %v300_v50, %v298_v39  ;;  %v394_v58 = vcombine.high %v392_v47, %v392_v47 }
  0xf1   : > { %v317_v55 = vmul.f32 %v310_v44, %v302_v51  ;;  %v318_v56 = vmul.f32 %v314_v45, %v303_v52 }
  0xf3   : > { %v377_v59 = vpop.permute.xlu1 %376  ;;  %v439_v61 = vmul.f32 %v437_v30, %v317_v55  ;;  %v350_v63 = vmul.f32 %v348_v18, %v317_v55  ;;  %v351_v5 = vmul.f32 %v348_v18, %v318_v56  ;;  %v440_v16 = vmul.f32 %v437_v30, %v318_v56 }
  0xf4   : > { %v379_v0 = vmul.f32 %v377_v59, %v295_v38  ;;  %v380_v1 = vmul.f32 %v377_v59, %v296_v46  ;;  %v370_v30 = vrot.slane %v361_v22, %v1096_v29 }
  0xf5   : > { %v441_v3 = vadd.f32 %v439_v61, %v431_v60  ;;  %v352_v4 = vadd.f32 %v350_v63, %v342_v62  ;;  %v353_v15 = vadd.f32 %v351_v5, %v343_v7  ;;  %v442_v20 = vadd.f32 %v440_v16, %v432_v19 }
  0xf6   : > { %v396_v6 = vadd.f32 %v392_v47, %v379_v0  ;;  %v397_v8 = vadd.f32 %v394_v58, %v380_v1 }
  0xf7   : > { %443 = vrot.lane.b32.xlu1 %v441_v3, %s889_s6  ;;  %354 = vrot.lane.b32.xlu0 %v352_v4, %s890_s11 }
  0xf8   : > { %v402_v11 = vpop.permute.xlu1 %401 }
  0xf9   : > { %v404_v13 = vmul.f32 %v402_v11, %v317_v55  ;;  %v405_v14 = vmul.f32 %v402_v11, %v318_v56 }
  0xfb   : > { %v406_v17 = vadd.f32 %v404_v13, %v396_v6  ;;  %v407_v18 = vadd.f32 %v405_v14, %v397_v8  ;;  %356 = vrot.lane.b32.xlu1 %v353_v15, %s890_s11  ;;  %470 = vperm.xlu0 %727, %v467_v12   ;;  %s787_s11 = scalar_lea.vmem %s1132_s27, 128 }
  0xfc   : > { %p788_p2 = scmp.ne.s32.totalorder %s1132_s27, %s787_s11  ;;  %p795_p12 = scmp.lt.s32.totalorder %s793_s9, %s787_s11 }
  0xfe   : > { %p789_p6 = pnand %p788_p2, %p1018_p13  ;;  %p796_p0 = por %p795_p12, %p794_p9 }
  0xff   : > { %445 = vrot.lane.b32.xlu1 %v442_v20, %s889_s6  ;;  %s481_s6 = scalar_lea.sflag [#allocation4], %s1068_s22 }
 0x100   : > { %p790_p8 = pneg %p789_p6 }
 0x102   : > { %p797_p5 = pnand %p796_p0, %p790_p8 }
 0x169   : > { %v444_v21 = vpop.permute.xlu1 %443  ;;  %v355_v27 = vpop.permute.xlu0 %354 }
 0x16d   : > { %v357_v24 = vpop.permute.xlu1 %356 }
 0x16e   : > { %v359_v31 = vsel %vm358_vm2, %v355_v27, %v357_v24  ;;  %v360_v32 = vsel %vm358_vm2, %v357_v24, %v355_v27 }
 0x16f   : > { %v373_v38 = vmul.f32 %v366_v28, %v360_v32  ;;  %v374_v39 = vmul.f32 %v370_v30, %v359_v31 }
 0x171   : > { %v446_v35 = vpop.permute.xlu1 %445  ;;  %v408_v42 = vadd.f32 %v406_v17, %v373_v38  ;;  %v409_v43 = vadd.f32 %v407_v18, %v374_v39 }
 0x172   : > { %v448_v36 = vsel %vm447_vm3, %v444_v21, %v446_v35  ;;  %v449_v37 = vsel %vm447_vm3, %v446_v35, %v444_v21 }
 0x173   : > { %v463_v40 = vmul.f32 %v456_v33, %v448_v36  ;;  %v464_v41 = vmul.f32 %v460_v34, %v449_v37 }
 0x175   : > { %v465_v23 = vadd.f32 %v463_v40, %v408_v42  ;;  %v466_v44 = vadd.f32 %v464_v41, %v409_v43 }
 0x17a   : > { %v471_v45 = vpop.permute.xlu0 %470 }
 0x17b   : > { %v473_v26 = vadd.f32 %v471_v45, %v465_v23  ;;  %v474_v29 = vadd.f32 %v471_v45, %v466_v44 }
 0x17d   : > { %v477_v46 = vcombine.low %v473_v26, %v474_v29 }
 0x17f   : > { %479 = vst [vmem:[%s264_s25] sm:$0xff] %v477_v46 }
 0x180   : > { %800 = shalt.err (!%p797_p5)
}
 0x181   : > { %s801_s22 = scalar_lea.hbm %s1130_s21, 128  ;;  %s805_s28 = scalar_lea.hbm %s1183_s4, 256 }
 0x182   : > { %p802_p10 = scmp.ne.s32.totalorder %s1130_s21, %s801_s22  ;;  %p806_p7 = scmp.lt.u32.totalorder %s1130_s21, %s1183_s4 }
 0x183   : > { %p807_p3 = scmp.lt.u32.totalorder %s805_s28, %s801_s22  ;;  %p809_p2 = scmp.lt.u32.totalorder %s801_s22, %s1130_s21 }
 0x184   : > { %p803_p4 = pnand %p802_p10, %p1018_p13 }
 0x185   : > { %p808_p11 = por %p807_p3, %p806_p7 }
 0x186   : > { %p804_p1 = pneg %p803_p4 }
 0x187   : > { %p810_p6 = por %p809_p2, %p808_p11 }
 0x189   : > { %p811_p8 = pnand %p810_p6, %p804_p1 }
 0x18b   : > { %814 = shalt.err (!%p811_p8)
}
 0x18c   : > { %637 = dma.vmem_to_hbm [thread:$0]  (%p1018_p13), %s1132_s27, 128, %s1130_s21, %s481_s6  }
 0x18d PF: > { %s509_s23 = sand.u32 1, %s853_s15   ;;  %p1202_p9 = scmp.ne.s32.totalorder %s1191_s26, 0 }
 0x18e   : > { %p1203_p12 = scmp.ge.s32.totalorder %s873_s20, 2  ;;  %s510_s25 = scalar_lea.sflag [#allocation4], %s509_s23 }
 0x190   : > { %p648_p0 = pnand %p1203_p12, %p1202_p9 }
 0x192   : > { %848 = dma.done.wait (!%p648_p0), %s510_s25, 128  }
 0x193   : > { %850 = vsyncadd (!%p648_p0), %s510_s25, 4294967168  ;;  %s21_s20 = sadd.s32 1, %s873_s20   ;;  %s1204_s15 = smov %s857_s16 }
 0x194   : > { %p18_p5 = scmp.ge.s32.totalorder %s21_s20, 4   ;;  %s1205_s16 = smov %s861_s17 }
 0x195   : > { %s1206_s17 = smov %s1026_s10  ;;  %s1207_s18 = smov %s869_s19 }
 0x196   : > { %s1208_s19 = smov %s1210_s5  ;;  %20 = sbr.rel (!%p18_p5) target bundleno = 7 (0x7), region = 92 }
 0x19d   :  { %515 = vsyncpa [#allocation3], 1 }
 0x19e   :  { %517 = vsyncpa [#allocation3 + $0x1], 1 }
 0x19f   :  { %518 = vsyncpa [#allocation6], 1 }
 0x1a0   :  { %519 = vsyncpa [#allocation4], 1 }
 0x1a1   :  { %521 = vsyncpa [#allocation4 + $0x1], 1 }

</bundles_post_ra>
